<compile_context>
chip_gen: v7x
topology: tpu7x:2x2x1
jax: 0.10.0
libtpu: 0.0.40
codegen_flags: <defaults>
</compile_context>

<pallas_src>
import jax
import jax.numpy as jnp
from jax.experimental import pallas as pl
from jax.experimental.pallas import tpu as pltpu


def _rowsum_bias_kernel(w_ref, b_ref, o_ref):
    # w_ref: (4,)   f32 in SMEM — torch Linear weight (out, in) flattened row-major
    # b_ref: (2,)   f32 in SMEM — bias scalars
    # o_ref: (2, 2) f32 in VMEM — already-permuted result
    #
    # With x == ones(2, 2):
    #   y = x @ W^T + b        ->  y[i, j]   = W[j, 0] + W[j, 1] + b[j]
    #   out = y^T (permute)    ->  out[j, i] = W[j, 0] + W[j, 1] + b[j]  (rows constant)
    s0 = w_ref[0] + w_ref[1] + b_ref[0]          # scalar ALU
    s1 = w_ref[2] + w_ref[3] + b_ref[1]          # scalar ALU
    row_idx = jax.lax.broadcasted_iota(jnp.int32, (2, 2), 0)
    o_ref[...] = jnp.where(row_idx == 0, s0, s1)  # one vector select + masked vst


def model_forward(x1, weight, bias):
    # The reference forward never uses x1 (it only builds tensors internally).
    del x1
    # TODO(synk): the original torch program is ill-formed (a 1-element tensor
    # cannot be .view(2, 2)'d and permute(0, 2, 1) needs 3 dims); we keep the
    # interpretation of a (2, 2) ones matrix with an implicit leading batch dim
    # of 1 for the permute.  With x == ones, the matmul reduces to rowsum(W)+b.
    out2d = pl.pallas_call(
        _rowsum_bias_kernel,
        out_shape=jax.ShapeDtypeStruct((2, 2), jnp.float32),
        in_specs=[
            pl.BlockSpec(memory_space=pltpu.MemorySpace.SMEM),  # weight (4,) scalars
            pl.BlockSpec(memory_space=pltpu.MemorySpace.SMEM),  # bias   (2,) scalars
        ],
        out_specs=pl.BlockSpec(memory_space=pltpu.MemorySpace.VMEM),
        cost_estimate=pl.CostEstimate(flops=6, transcendentals=0,
                                      bytes_accessed=40),
    )(weight.reshape(4), bias)

    # v2 = v1.permute(0, 2, 1) -> (1, 2, 2); the permuted layout is produced
    # directly in-kernel, so only the leading batch dim is added here.
    return out2d[None, :, :]


if __name__ == "__main__":
    key = jax.random.PRNGKey(0)
    k_x, k_w, k_b = jax.random.split(key, 3)

    # Unused input of the forward pass (kept to mirror the module signature).
    x1 = jax.random.normal(k_x, (2, 2), dtype=jnp.float32)

    # Deterministic Linear(2, 2) parameters (PyTorch-style uniform init, bound = 1/sqrt(in)).
    bound = 1.0 / jnp.sqrt(2.0)
    weight = jax.random.uniform(k_w, (2, 2), jnp.float32, -bound, bound)
    bias = jax.random.uniform(k_b, (2,), jnp.float32, -bound, bound)

    out = model_forward(x1, weight, bias)
    out = jax.block_until_ready(out)

    # Reference check in plain JAX (matches the original torch semantics:
    # linear(ones(2,2)) followed by a transpose of the last two axes).
    ref = (jnp.ones((2, 2), jnp.float32) @ weight.T + bias).T[None]
    assert out.shape == (1, 2, 2)
    assert jnp.allclose(out, ref, atol=1e-5), (out, ref)

    print("KERNEL_OK")
</pallas_src>

<mosaic_0001>
module attributes {stable_mosaic.version = 11 : i64} {
  func.func @_rowsum_bias_kernel(%arg0: memref<4xf32, #tpu.memory_space<smem>>, %arg1: memref<2xf32, #tpu.memory_space<smem>>, %arg2: memref<2x2xf32, #tpu.memory_space<vmem>>) attributes {dimension_semantics = [], scalar_prefetch = 0 : i64, scratch_operands = 0 : i64, tpu.core_type = #tpu.core_type<tc>} {
    %c0 = arith.constant 0 : index
    %0 = memref.load %arg0[%c0] : memref<4xf32, #tpu.memory_space<smem>>
    %c1 = arith.constant 1 : index
    %1 = memref.load %arg0[%c1] : memref<4xf32, #tpu.memory_space<smem>>
    %2 = arith.addf %0, %1 : f32
    %c0_0 = arith.constant 0 : index
    %3 = memref.load %arg1[%c0_0] : memref<2xf32, #tpu.memory_space<smem>>
    %4 = arith.addf %2, %3 : f32
    %c2 = arith.constant 2 : index
    %5 = memref.load %arg0[%c2] : memref<4xf32, #tpu.memory_space<smem>>
    %c3 = arith.constant 3 : index
    %6 = memref.load %arg0[%c3] : memref<4xf32, #tpu.memory_space<smem>>
    %7 = arith.addf %5, %6 : f32
    %c1_1 = arith.constant 1 : index
    %8 = memref.load %arg1[%c1_1] : memref<2xf32, #tpu.memory_space<smem>>
    %9 = arith.addf %7, %8 : f32
    %10 = tpu.iota {dimensions = array<i32: 0>} : vector<2x2xi32>
    %c0_i32 = arith.constant 0 : i32
    %11 = vector.broadcast %c0_i32 : i32 to vector<2x2xi32>
    %12 = arith.cmpi eq, %10, %11 : vector<2x2xi32>
    %13 = vector.broadcast %4 : f32 to vector<2x2xf32>
    %14 = vector.broadcast %9 : f32 to vector<2x2xf32>
    %15 = arith.select %12, %13, %14 : vector<2x2xi1>, vector<2x2xf32>
    %c0_2 = arith.constant 0 : index
    %c0_3 = arith.constant 0 : index
    %16 = vector.load %arg2[%c0_2, %c0_3] : memref<2x2xf32, #tpu.memory_space<vmem>>, vector<2x2xf32>
    tpu.vector_store %arg2[%c0_2, %c0_3], %15 {strides = array<i32>} : memref<2x2xf32, #tpu.memory_space<vmem>>, vector<2x2xf32>,
    return
  }
}

</mosaic_0001>

<bundles_post_ra>
// kernel: tpu_custom_call.1
= control target key start
LH: loop header
LB: loop body
LE: loop exit
PB: predicated region body
PF: predicated region fallthrough
CT: control target
= control target key end

     0   :  { %7 = vsyncpa [#allocation4], 0  ;;  %s171_s0 = inlined_call_operand.hbm [shape: f32[4], index: 0, kind: input, shape index: {}]   ;;  %s172_s1 = inlined_call_operand.vmem [shape: f32[2], index: 1, kind: input, shape index: {}]   ;;  %s173_s2 = inlined_call_operand.hbm [shape: f32[2,2], index: 2, kind: output, shape index: {}]  }
   0x1   :  { %8 = vsyncpa [#allocation5], 0 }
   0x2   :  { %9 = vsyncpa [#allocation3], 0  ;;  %s24_s11 = sshll.u32 %s172_s1, 4  ;;  %s76_s14 = scalar_lea.hbm %s171_s0, 16  ;;  %s25_s11 = int_to_ptr.vmem [resolvable:$true] %s24_s11 }
   0x3   :  { %p77_p0 = scmp.ne.s32.totalorder %s171_s0, %s76_s14  ;;  %p80_p1 = scmp.lt.u32.totalorder %s76_s14, %s171_s0 }
   0x5   :  { %p82_p2 = pnand %p80_p1, %p77_p0 }
   0x7   :  { %85 = shalt.err (!%p82_p2)
}
   0x8   :  { %s126_s19 = smov [#allocation2]   ;;  %s86_s1 = scalar_lea.vmem %s25_s11, 16 }
   0x9   :  { %17 = dma.hbm_to_smem %s171_s0, 16, %s126_s19, [#allocation4]  }
   0xa   :  { %p87_p3 = scmp.ne.s32.totalorder %s25_s11, %s86_s1  ;;  %p91_p4 = scmp.lt.s32.totalorder %s25_s11, %s25_s11 }
   0xb   :  { %p92_p5 = scmp.lt.s32.totalorder %s86_s1, %s86_s1 }
   0xd   :  { %p93_p6 = por %p92_p5, %p91_p4 }
   0xf   :  { %p94_p7 = pnand %p93_p6, %p87_p3 }
  0x11   :  { %97 = shalt.err (!%p94_p7)
}
  0x12   :  { %s127_s22 = smov [#allocation6]  }
  0x13   :  { %27 = dma.vmem_to_smem %s25_s11, 16, %s127_s22, [#allocation5]  }
  0x14   :  { %120 = dma.done.wait [#allocation4], 16  }
  0x15   :  { %121 = vsyncadd [#allocation4], 4294967280 }
  0x16   :  { %122 = dma.done.wait [#allocation5], 16  }
  0x17   :  { %123 = vsyncadd [#allocation5], 4294967280 }
  0x18   :  { %34 = sfence }
  0x19   :  { %s35_s23 = sld [smem:[#allocation2]]  ;;  %s69_s24 = sld [smem:[#allocation2 + $0x1]]  ;;  %v45_v0 = vlaneseq  ;;  %vm51_vm1 = vcmask 9216  }
  0x1a   :  { %s38_s25 = sld [smem:[#allocation6]]  ;;  %s70_s26 = sld [smem:[#allocation2 + $0x2]] }
  0x1b   :  { %s71_s0 = sld [smem:[#allocation2 + $0x3]]  ;;  %s72_s27 = sld [smem:[#allocation6 + $0x1]]  ;;  %v46_v1 = vshrl.u32 %v45_v0, 7 }
  0x1c   :  { %s128_s3 = smov [#allocation7]  }
  0x1d   :  { %s59_s4 = sshll.u32 %s128_s3, 4  ;;  %vm47_vm0 = vcmp.eq.s32.totalorder %v46_v1, 0  ;;  %s60_s4 = int_to_ptr.vmem [resolvable:$true] %s59_s4 }
  0x1e   :  { %s98_s6 = scalar_lea.vmem %s60_s4, 32  ;;  %p103_p9 = scmp.lt.s32.totalorder %s60_s4, %s60_s4 }
  0x1f   :  { %s37_s28 = sadd.f32 %s69_s24, %s35_s23  ;;  %p99_p8 = scmp.ne.s32.totalorder %s60_s4, %s98_s6 }
  0x20   :  { %p104_p10 = scmp.lt.s32.totalorder %s98_s6, %s98_s6 }
  0x21   :  { %s39_s29 = sadd.f32 %s38_s25, %s37_s28 }
  0x22   :  { %s42_s30 = sadd.f32 %s71_s0, %s70_s26  ;;  %p105_p11 = por %p104_p10, %p103_p9 }
  0x23   :  { %v48_v2 = vstv %s39_s29 }
  0x24   :  { %s44_s5 = sadd.f32 %s72_s27, %s42_s30  ;;  %p106_p12 = pnand %p105_p11, %p99_p8 }
  0x26   :  { %v49_v3 = vstv %s44_s5 }
  0x27   :  { %v50_v4 = vsel %vm47_vm0, %v48_v2, %v49_v3 }
  0x28   :  { %52 = vst.msk [vmem:[#allocation7] sm:$0x3] %vm51_vm1, %v50_v4 }
  0x29   :  { %109 = shalt.err (!%p106_p12)
}
  0x2a   :  { %s110_s9 = scalar_lea.hbm %s173_s2, 32 }
  0x2b   :  { %p111_p13 = scmp.ne.s32.totalorder %s173_s2, %s110_s9  ;;  %p114_p0 = scmp.lt.u32.totalorder %s110_s9, %s173_s2 }
  0x2d   :  { %p116_p1 = pnand %p114_p0, %p111_p13 }
  0x2f   :  { %119 = shalt.err (!%p116_p1)
}
  0x30   :  { %62 = dma.vmem_to_hbm [thread:$0]  %s60_s4, 32, %s173_s2, [#allocation3]  }
  0x31   :  { %124 = dma.done.wait [#allocation3], 32  }
  0x32   :  { %125 = vsyncadd [#allocation3], 4294967264 }
  0x33   :  { %66 = vsyncpa [#allocation3], 1 }
  0x34   :  { %67 = vsyncpa [#allocation4], 1 }
  0x35   :  { %68 = vsyncpa [#allocation5], 1 }

</bundles_post_ra>
